<compile_context>
chip_gen: v5e
topology: v5e:2x2
jax: 0.10.0
libtpu: 0.0.40
codegen_flags: <defaults>
</compile_context>

<pallas_src>
import jax
import jax.numpy as jnp
import numpy as np
from jax import lax
from jax.experimental import pallas as pl
from jax.experimental.pallas import tpu as pltpu


# ------------------------------ small helpers --------------------------------
def _round_up(x, m):
    return ((x + m - 1) // m) * m


def _pick_tile(dim, preferred, align):
    """Tile size (multiple of `align`): the array is padded up to a multiple of it."""
    if dim <= preferred:
        return _round_up(dim, align)
    return max((preferred // align) * align, align)


def _device_kind():
    try:
        return jax.devices()[0].device_kind.lower()
    except Exception:
        return ""


def _gemm_tile_prefs():
    kind = _device_kind()
    # v5e: 4x128^2 MXU -> 128-row tiles already saturate it; scoped VMEM is small.
    if "v5 lite" in kind or "v5e" in kind or "v5litepod" in kind:
        return 128, 256, 512
    # v6e / v7x: 256-wide MXU -> bigger output tiles.
    return 256, 512, 512


# ----------------------- tiled GEMM (+bias) kernel ---------------------------
def _matmul_bias_kernel(x_ref, w_ref, b_ref, o_ref, acc_ref):
    k = pl.program_id(2)

    @pl.when(k == 0)
    def _():
        acc_ref[...] = jnp.zeros_like(acc_ref)

    acc_ref[...] += jnp.dot(x_ref[...], w_ref[...],
                            preferred_element_type=jnp.float32)

    @pl.when(k == pl.num_programs(2) - 1)
    def _():
        o_ref[...] = (acc_ref[...] + b_ref[...]).astype(o_ref.dtype)


def matmul_bias(x, w, b, *, out_dtype=jnp.float32):
    """x: (M, K) bf16; w: (K, N) bf16; b: (1, N) f32  ->  (M, N) out_dtype.

    Pads M/N/K up to tile multiples (zero padding is exact for the matmul;
    padded output rows/cols are sliced off), so arbitrary vocab / seq sizes
    never force a full-dimension block into VMEM.
    """
    M, K = x.shape
    Kw, N = w.shape
    assert K == Kw and b.shape == (1, N)

    tm_pref, tn_pref, tk_pref = _gemm_tile_prefs()
    tm = _pick_tile(M, tm_pref, 16)    # 16: bf16 packs two rows per sublane
    tn = _pick_tile(N, tn_pref, 128)
    tk = _pick_tile(K, tk_pref, 128)
    Mp, Kp, Np = _round_up(M, tm), _round_up(K, tk), _round_up(N, tn)

    if (Mp, Kp) != (M, K):
        x = jnp.pad(x, ((0, Mp - M), (0, Kp - K)))
    if (Kp, Np) != (K, N):
        w = jnp.pad(w, ((0, Kp - K), (0, Np - N)))
    if Np != N:
        b = jnp.pad(b, ((0, 0), (0, Np - N)))

    grid = (Mp // tm, Np // tn, Kp // tk)
    out_itemsize = jnp.dtype(out_dtype).itemsize
    # double-buffered inputs + double-buffered output + f32 accumulator (+ slack)
    vmem_bytes = (2 * tm * tk * x.dtype.itemsize
                  + 2 * tk * tn * w.dtype.itemsize
                  + 2 * tn * 4
                  + 2 * tm * tn * out_itemsize
                  + tm * tn * 4)
    vmem_limit = int(min(max(2 * vmem_bytes, 16 * 1024 * 1024), 64 * 1024 * 1024))

    out = pl.pallas_call(
        _matmul_bias_kernel,
        out_shape=jax.ShapeDtypeStruct((Mp, Np), out_dtype),
        grid_spec=pltpu.PrefetchScalarGridSpec(
            num_scalar_prefetch=0,
            grid=grid,
            in_specs=[
                pl.BlockSpec((tm, tk), lambda i, j, k: (i, k)),
                pl.BlockSpec((tk, tn), lambda i, j, k: (k, j)),
                pl.BlockSpec((1, tn), lambda i, j, k: (0, j)),
            ],
            out_specs=pl.BlockSpec((tm, tn), lambda i, j, k: (i, j)),
            scratch_shapes=[pltpu.VMEM((tm, tn), jnp.float32)],
        ),
        compiler_params=pltpu.CompilerParams(
            dimension_semantics=("parallel", "parallel", "arbitrary"),
            vmem_limit_bytes=vmem_limit,
        ),
        cost_estimate=pl.CostEstimate(
            flops=2 * Mp * Np * Kp,
            transcendentals=0,
            bytes_accessed=(Mp * Kp * x.dtype.itemsize
                            + Kp * Np * w.dtype.itemsize
                            + Np * 4 + Mp * Np * out_itemsize)),
    )(x, w, b)

    if (Mp, Np) != (M, N):
        out = out[:M, :N]
    return out


# ----------------------- chunked LSTM recurrence kernel ----------------------
def _lstm_rec_kernel(xp_ref, whh_ref, o_ref, h_scr, c_scr):
    # xp_ref : (Tc, B, 4H) f32 pre-activations (x @ W_ih + b_ih + b_hh)
    # whh_ref: (H, 4H) bf16 recurrent weight (pre-transposed)
    # o_ref  : (Tc, B, H) bf16 hidden outputs
    # h_scr/c_scr: (B, H) f32 carries, persist across grid steps
    @pl.when(pl.program_id(0) == 0)
    def _():
        h_scr[...] = jnp.zeros_like(h_scr)
        c_scr[...] = jnp.zeros_like(c_scr)

    H = h_scr.shape[-1]
    Tc = xp_ref.shape[0]
    whh = whh_ref[...]  # hoisted out of the unrolled loop body (single VMEM read)

    def step(t, carry):
        h = h_scr[...]
        c = c_scr[...]
        # bf16 MXU operands on the serial critical path, f32 accumulation.
        gates = xp_ref[t] + jnp.dot(h.astype(jnp.bfloat16), whh,
                                    preferred_element_type=jnp.float32)
        # PyTorch gate order [i, f, g, o]; H multiple of 128 -> lane-aligned slices.
        i_g = jax.nn.sigmoid(gates[:, 0 * H:1 * H])
        f_g = jax.nn.sigmoid(gates[:, 1 * H:2 * H])
        g_g = jnp.tanh(gates[:, 2 * H:3 * H])
        o_g = jax.nn.sigmoid(gates[:, 3 * H:4 * H])
        c_new = f_g * c + i_g * g_g
        h_new = o_g * jnp.tanh(c_new)
        h_scr[...] = h_new
        c_scr[...] = c_new
        o_ref[t] = h_new.astype(o_ref.dtype)
        return carry

    lax.fori_loop(0, Tc, step, 0, unroll=4)


def lstm_recurrence(xproj, whh_t, *, tc_pref=16):
    """xproj: (T, B, 4H) f32 pre-activations; whh_t: (H, 4H) bf16 -> (T, B, H) bf16."""
    T, B, G = xproj.shape
    H = whh_t.shape[0]
    assert G == 4 * H

    Tc = min(tc_pref, T)
    Tp = _round_up(T, Tc)
    if Tp != T:
        # Zero pre-activations for padded steps: they only affect later (padded)
        # outputs, which are sliced off below, so earlier outputs are exact.
        xproj = jnp.pad(xproj, ((0, Tp - T), (0, 0), (0, 0)))

    vmem_bytes = (2 * Tc * B * G * 4        # double-buffered input slab (f32)
                  + 2 * H * G * 2           # W_hh bf16 (double-buffered by spec)
                  + 2 * Tc * B * H * 2      # double-buffered bf16 output
                  + 2 * B * H * 4)          # h/c carries
    vmem_limit = int(min(max(2 * vmem_bytes, 8 * 1024 * 1024), 64 * 1024 * 1024))

    # TODO(synk): for B >= 16-32 add a leading "parallel" batch-chunk grid axis
    # (per-chunk h/c scratch) so the recurrence shards across v7x's 2 TensorCores.
    out = pl.pallas_call(
        _lstm_rec_kernel,
        out_shape=jax.ShapeDtypeStruct((Tp, B, H), jnp.bfloat16),
        grid_spec=pltpu.PrefetchScalarGridSpec(
            num_scalar_prefetch=0,
            grid=(Tp // Tc,),
            in_specs=[
                pl.BlockSpec((Tc, B, G), lambda c: (c, 0, 0)),
                pl.BlockSpec((H, G), lambda c: (0, 0)),
            ],
            out_specs=pl.BlockSpec((Tc, B, H), lambda c: (c, 0, 0)),
            scratch_shapes=[
                pltpu.VMEM((B, H), jnp.float32),  # h carry
                pltpu.VMEM((B, H), jnp.float32),  # c carry
            ],
        ),
        compiler_params=pltpu.CompilerParams(
            dimension_semantics=("arbitrary",),  # recurrent over time chunks
            vmem_limit_bytes=vmem_limit,
        ),
    )(xproj, whh_t)

    if Tp != T:
        out = out[:T]
    return out


# --------------------------------- DecoderRNN --------------------------------
class DecoderRNNPallas:
    def __init__(self, embedSize, hiddenSize, vocabSize, numLayers, key):
        self.E, self.H, self.V, self.L = embedSize, hiddenSize, vocabSize, numLayers
        keys = jax.random.split(key, 1 + 4 * numLayers + 2)
        k = iter(keys)
        s = 1.0 / np.sqrt(hiddenSize)

        # Embedding table in bf16: its rows feed a bf16 GEMM directly.
        self.embed = jax.random.normal(next(k), (vocabSize, embedSize),
                                       jnp.float32).astype(jnp.bfloat16)

        # Per-layer LSTM params; weights stored pre-transposed for the kernels.
        # Both W_ih (hoisted GEMM) and W_hh (recurrence critical path) in bf16;
        # biases stay f32 (added in the f32 accumulator epilogue).
        self.wih_t, self.whh_t, self.bias = [], [], []
        for layer in range(numLayers):
            in_dim = embedSize if layer == 0 else hiddenSize
            w_ih = jax.random.uniform(next(k), (4 * hiddenSize, in_dim), jnp.float32, -s, s)
            w_hh = jax.random.uniform(next(k), (4 * hiddenSize, hiddenSize), jnp.float32, -s, s)
            b_ih = jax.random.uniform(next(k), (4 * hiddenSize,), jnp.float32, -s, s)
            b_hh = jax.random.uniform(next(k), (4 * hiddenSize,), jnp.float32, -s, s)
            self.wih_t.append(w_ih.T.astype(jnp.bfloat16))   # (in_dim, 4H) bf16
            self.whh_t.append(w_hh.T.astype(jnp.bfloat16))   # (H, 4H)      bf16
            self.bias.append((b_ih + b_hh)[None, :])          # (1, 4H)      f32

        # Output projection (weight bf16, bias f32).
        w_lin = jax.random.uniform(next(k), (vocabSize, hiddenSize), jnp.float32, -s, s)
        b_lin = jax.random.uniform(next(k), (vocabSize,), jnp.float32, -s, s)
        self.w_lin_t = w_lin.T.astype(jnp.bfloat16)           # (H, V) bf16
        self.b_lin = b_lin[None, :]                           # (1, V) f32

    def forward(self, features, captions):
        # Embedding lookup (glue, plain JAX gather) -> bf16 directly.
        emb = jnp.take(self.embed, captions, axis=0)                      # (seq, B, E) bf16
        # TODO(synk): nn.Dropout(0.5) treated as eval-mode identity (training-mode
        # stochastic masking cannot match torch RNG bit-for-bit).
        x = jnp.concatenate([features[None, :, :].astype(jnp.bfloat16), emb], axis=0)

        for layer in range(self.L):
            T, B, D = x.shape
            # Hoisted input projection: one large MXU GEMM over all timesteps.
            xproj = matmul_bias(
                x.reshape(T * B, D), self.wih_t[layer], self.bias[layer],
                out_dtype=jnp.float32,
            ).reshape(T, B, 4 * self.H)
            # Serial recurrence: only h @ W_hh per step, chunked over time; bf16 out.
            x = lstm_recurrence(xproj, self.whh_t[layer])                 # (T, B, H) bf16

        T, B, H = x.shape
        logits = matmul_bias(x.reshape(T * B, H), self.w_lin_t, self.b_lin,
                             out_dtype=jnp.float32)
        return logits.reshape(T, B, self.V)                               # (T, B, V) f32


# ------------------------------ reference (JAX) -------------------------------
def _reference_forward(model, features, captions):
    emb = jnp.take(model.embed, captions, axis=0).astype(jnp.float32)
    feat = features.astype(jnp.bfloat16).astype(jnp.float32)
    x = jnp.concatenate([feat[None], emb], axis=0)
    H = model.H
    for layer in range(model.L):
        wih = model.wih_t[layer].astype(jnp.float32)
        whh = model.whh_t[layer].astype(jnp.float32)
        b = model.bias[layer]
        h = jnp.zeros((x.shape[1], H), jnp.float32)
        c = jnp.zeros((x.shape[1], H), jnp.float32)
        outs = []
        for t in range(x.shape[0]):
            g = x[t] @ wih + h @ whh + b
            i_g = jax.nn.sigmoid(g[:, 0 * H:1 * H])
            f_g = jax.nn.sigmoid(g[:, 1 * H:2 * H])
            g_g = jnp.tanh(g[:, 2 * H:3 * H])
            o_g = jax.nn.sigmoid(g[:, 3 * H:4 * H])
            c = f_g * c + i_g * g_g
            h = o_g * jnp.tanh(c)
            outs.append(h)
        x = jnp.stack(outs, axis=0)
    return x @ model.w_lin_t.astype(jnp.float32) + model.b_lin


if __name__ == "__main__":
    # Small shapes; vocabSize=500 deliberately NOT a multiple of 128 to exercise
    # the padded-tile path of the vocab projection.
    embedSize, hiddenSize, vocabSize, numLayers = 128, 128, 500, 2
    batch, seq = 8, 15   # T = seq + 1 = 16

    key = jax.random.PRNGKey(0)
    k_model, k_feat, k_cap = jax.random.split(key, 3)

    model = DecoderRNNPallas(embedSize, hiddenSize, vocabSize, numLayers, k_model)

    features = jax.random.normal(k_feat, (batch, embedSize), jnp.float32)
    captions = jax.random.randint(k_cap, (seq, batch), 0, vocabSize, jnp.int32)

    out = jax.block_until_ready(model.forward(features, captions))
    assert out.shape == (seq + 1, batch, vocabSize), out.shape

    ref = _reference_forward(model, features, captions)
    np.testing.assert_allclose(np.asarray(out), np.asarray(ref), rtol=2e-2, atol=2e-2)

    print("KERNEL_OK")
</pallas_src>

<mosaic_0001>
module attributes {stable_mosaic.version = 11 : i64} {
  func.func @_matmul_bias_kernel(%arg0: i32, %arg1: i32, %arg2: i32, %arg3: memref<128x128xbf16, #tpu.memory_space<vmem>>, %arg4: memref<128x512xbf16, #tpu.memory_space<vmem>>, %arg5: memref<1x512xf32, #tpu.memory_space<vmem>>, %arg6: memref<128x512xf32, #tpu.memory_space<vmem>>, %arg7: memref<128x512xf32, #tpu.memory_space<vmem>>) attributes {dimension_semantics = [#tpu.dimension_semantics<parallel>, #tpu.dimension_semantics<parallel>, #tpu.dimension_semantics<arbitrary>], iteration_bounds = array<i64: 1, 1, 1>, scalar_prefetch = 0 : i64, scratch_operands = 1 : i64, tpu.core_type = #tpu.core_type<tc>, window_params = [{transform_indices = @transform_0, window_bounds = array<i64: 128, 128>}, {transform_indices = @transform_1, window_bounds = array<i64: 128, 512>}, {transform_indices = @transform_2, window_bounds = array<i64: 1, 512>}, {transform_indices = @transform_3, window_bounds = array<i64: 128, 512>}]} {
    %c0_i32 = arith.constant 0 : i32
    %0 = arith.cmpi eq, %arg2, %c0_i32 : i32
    %1 = arith.extui %0 : i1 to i32
    %c0_i32_0 = arith.constant 0 : i32
    %2 = arith.cmpi ne, %1, %c0_i32_0 : i32
    scf.if %2 {
      %cst_10 = arith.constant 0.000000e+00 : f32
      %12 = vector.broadcast %cst_10 : f32 to vector<128x512xf32>
      %c0_11 = arith.constant 0 : index
      %c0_12 = arith.constant 0 : index
      %13 = vector.load %arg7[%c0_11, %c0_12] : memref<128x512xf32, #tpu.memory_space<vmem>>, vector<128x512xf32>
      tpu.vector_store %arg7[%c0_11, %c0_12], %12 {strides = array<i32>} : memref<128x512xf32, #tpu.memory_space<vmem>>, vector<128x512xf32>,
    } else {
    }
    %c0 = arith.constant 0 : index
    %c0_1 = arith.constant 0 : index
    %3 = vector.load %arg7[%c0, %c0_1] : memref<128x512xf32, #tpu.memory_space<vmem>>, vector<128x512xf32>
    %c0_2 = arith.constant 0 : index
    %c0_3 = arith.constant 0 : index
    %4 = vector.load %arg3[%c0_2, %c0_3] : memref<128x128xbf16, #tpu.memory_space<vmem>>, vector<128x128xbf16>
    %c0_4 = arith.constant 0 : index
    %c0_5 = arith.constant 0 : index
    %5 = vector.load %arg4[%c0_4, %c0_5] : memref<128x512xbf16, #tpu.memory_space<vmem>>, vector<128x512xbf16>
    %cst = arith.constant dense<0.000000e+00> : vector<128x512xf32>
    %6 = tpu.matmul %4, %5, %cst {dimension_numbers = #tpu.dot_dimension_numbers<[1], [0], [0], [1], [0, 0, 1, 1], [], []>} : vector<128x128xbf16>, vector<128x512xbf16>, vector<128x512xf32> -> vector<128x512xf32>
    %7 = arith.addf %3, %6 : vector<128x512xf32>
    %c0_6 = arith.constant 0 : index
    %c0_7 = arith.constant 0 : index
    %8 = vector.load %arg7[%c0_6, %c0_7] : memref<128x512xf32, #tpu.memory_space<vmem>>, vector<128x512xf32>
    tpu.vector_store %arg7[%c0_6, %c0_7], %7 {strides = array<i32>} : memref<128x512xf32, #tpu.memory_space<vmem>>, vector<128x512xf32>,
    %c0_i32_8 = arith.constant 0 : i32
    %9 = arith.cmpi eq, %arg2, %c0_i32_8 : i32
    %10 = arith.extui %9 : i1 to i32
    %c0_i32_9 = arith.constant 0 : i32
    %11 = arith.cmpi ne, %10, %c0_i32_9 : i32
    scf.if %11 {
      %c0_10 = arith.constant 0 : index
      %c0_11 = arith.constant 0 : index
      %12 = vector.load %arg7[%c0_10, %c0_11] : memref<128x512xf32, #tpu.memory_space<vmem>>, vector<128x512xf32>
      %c0_12 = arith.constant 0 : index
      %c0_13 = arith.constant 0 : index
      %13 = vector.load %arg5[%c0_12, %c0_13] : memref<1x512xf32, #tpu.memory_space<vmem>>, vector<1x512xf32>
      %14 = vector.broadcast %13 : vector<1x512xf32> to vector<128x512xf32>
      %15 = arith.addf %12, %14 : vector<128x512xf32>
      %c0_14 = arith.constant 0 : index
      %c0_15 = arith.constant 0 : index
      %16 = vector.load %arg6[%c0_14, %c0_15] : memref<128x512xf32, #tpu.memory_space<vmem>>, vector<128x512xf32>
      tpu.vector_store %arg6[%c0_14, %c0_15], %15 {strides = array<i32>} : memref<128x512xf32, #tpu.memory_space<vmem>>, vector<128x512xf32>,
    } else {
    }
    return
  }
  func.func @transform_0(%arg0: i32, %arg1: i32, %arg2: i32) -> (i32, i32) {
    %c0_i32 = arith.constant 0 : i32
    return %arg0, %arg2 : i32, i32
  }
  func.func @transform_1(%arg0: i32, %arg1: i32, %arg2: i32) -> (i32, i32) {
    %c0_i32 = arith.constant 0 : i32
    return %arg2, %arg1 : i32, i32
  }
  func.func @transform_2(%arg0: i32, %arg1: i32, %arg2: i32) -> (i32, i32) {
    %c0_i32 = arith.constant 0 : i32
    %c0_i32_0 = arith.constant 0 : i32
    return %c0_i32, %arg1 : i32, i32
  }
  func.func @transform_3(%arg0: i32, %arg1: i32, %arg2: i32) -> (i32, i32) {
    %c0_i32 = arith.constant 0 : i32
    return %arg0, %arg1 : i32, i32
  }
}

</mosaic_0001>

<bundles_post_ra>
// kernel: tpu_custom_call.1
= control target key start
LH: loop header
LB: loop body
LE: loop exit
PB: predicated region body
PF: predicated region fallthrough
CT: control target
= control target key end

     0   :  { %8 = vsyncpa [#allocation4], 0  ;;  %s1423_s0 = inlined_call_operand.hbm [shape: bf16[128,128], index: 0, kind: input, shape index: {}]   ;;  %s1424_s1 = inlined_call_operand.hbm [shape: bf16[128,512], index: 1, kind: input, shape index: {}]   ;;  %s1425_s2 = inlined_call_operand.hbm [shape: f32[1,512], index: 2, kind: input, shape index: {}]   ;;  %s1426_s3 = inlined_call_operand.hbm [shape: f32[128,512], index: 3, kind: output, shape index: {}]  }
   0x1   :  { %9 = vsyncpa [#allocation7], 0  ;;  %s28_s14 = sshll.u32 %s1424_s1, 4  ;;  %s29_s14 = int_to_ptr.hbm [resolvable:$true] %s28_s14 }
   0x2   :  { %10 = vsyncpa [#allocation5], 0  ;;  %s1309_s15 = smov [#allocation6]   ;;  %s15_s19 = sshll.u32 %s1423_s0, 4  ;;  %s16_s19 = int_to_ptr.hbm [resolvable:$true] %s15_s19 }
   0x3   :  { %s30_s16 = sshll.u32 %s1309_s15, 4  ;;  %s1310_s20 = smov 256   ;;  %s31_s16 = int_to_ptr.vmem [resolvable:$true] %s30_s16 }
   0x4   :  { %s1311_s21 = smov 16   ;;  %s1312_s22 = smov [#allocation3]  }
   0x5   :  { %36 = dma.hbm_to_vmem [thread:$0]  %s29_s14, 4096, %s31_s16, [#allocation7], %s1310_s20, %s1310_s20, %s1311_s21  }
   0x6   :  { %s17_s23 = sshll.u32 %s1312_s22, 4  ;;  %s1313_s24 = smov 64   ;;  %s18_s23 = int_to_ptr.vmem [resolvable:$true] %s17_s23 }
   0x7   :  { %s1314_s25 = smov 4   ;;  %s42_s27 = sshll.u32 %s1425_s2, 4  ;;  %s43_s27 = int_to_ptr.hbm [resolvable:$true] %s42_s27 }
   0x8   :  { %23 = dma.hbm_to_vmem [thread:$0]  %s16_s19, 1024, %s18_s23, [#allocation4], %s1313_s24, %s1313_s24, %s1314_s25  }
   0x9   :  { %s1315_s28 = smov [#allocation8]  }
   0xa   :  { %s44_s29 = sshll.u32 %s1315_s28, 4  ;;  %s45_s29 = int_to_ptr.vmem [resolvable:$true] %s44_s29 }
   0xb   :  { %47 = dma.hbm_to_vmem [thread:$0]  %s43_s27, 64, %s45_s29, [#allocation7]  }
   0xc   :  { %1303 = dma.done.wait [#allocation4], 1024  }
   0xd   :  { %1304 = vsyncadd [#allocation4], 4294966272 }
   0xe   :  { %1305 = dma.done.wait [#allocation7], 4160  }
   0xf   :  { %1306 = vsyncadd [#allocation7], 4294963136  ;;  %v1143_v0 = vld [vmem:[#allocation6 + $0xe0] sm:$0xf]  ;;  %v1195_v1 = vld [vmem:[#allocation6 + $0xec] sm:$0xf0] }
  0x10   :  { %v1193_v2 = vld [vmem:[#allocation6 + $0xe4] sm:$0xf]  ;;  %v1144_v3 = vor.u32 %v1195_v1, %v1143_v0  ;;  %v1145_v4 = vld [vmem:[#allocation6 + $0xf0] sm:$0xf0]  ;;  %v1151_v5 = vld [vmem:[#allocation6 + $0xe8] sm:$0xf] }
  0x11   :  { %v1196_v6 = vld [vmem:[#allocation6 + $0xf4] sm:$0xf0]  ;;  %v1148_v7 = vor.u32 %v1193_v2, %v1145_v4  ;;  %v1194_v9 = vld [vmem:[#allocation6 + $0xec] sm:$0xf]  ;;  %v1153_v10 = vld [vmem:[#allocation6 + $0xf8] sm:$0xf0] }
  0x12   :  { %v1152_v8 = vor.u32 %v1196_v6, %v1151_v5  ;;  %v1127_v11 = vld [vmem:[#allocation6 + $0xc0] sm:$0xf]  ;;  %448 = vmatpush.bf16.msra.mxu0 %v1144_v3  ;;  %v1156_v12 = vor.u32 %v1194_v9, %v1153_v10  ;;  %v1191_v13 = vld [vmem:[#allocation6 + $0xcc] sm:$0xf0]  ;;  %v1189_v14 = vld [vmem:[#allocation6 + $0xc4] sm:$0xf] }
  0x13   :  { %v1129_v15 = vld [vmem:[#allocation6 + $0xd0] sm:$0xf0]  ;;  %497 = vmatpush.bf16.msra.mxu1 %v1148_v7  ;;  %v1128_v16 = vor.u32 %v1191_v13, %v1127_v11  ;;  %v1135_v18 = vld [vmem:[#allocation6 + $0xc8] sm:$0xf]  ;;  %v1192_v19 = vld [vmem:[#allocation6 + $0xd4] sm:$0xf0] }
  0x14   :  { %546 = vmatpush.bf16.msra.mxu2 %v1152_v8  ;;  %v1132_v17 = vor.u32 %v1189_v14, %v1129_v15  ;;  %v1190_v20 = vld [vmem:[#allocation6 + $0xcc] sm:$0xf]  ;;  %595 = vmatpush.bf16.msra.mxu3 %v1156_v12  ;;  %v1136_v21 = vor.u32 %v1192_v19, %v1135_v18  ;;  %v1137_v22 = vld [vmem:[#allocation6 + $0xd8] sm:$0xf0]  ;;  %v1111_v23 = vld [vmem:[#allocation6 + $0xa0] sm:$0xf] }
  0x15   :  { %v1187_v24 = vld [vmem:[#allocation6 + $0xac] sm:$0xf0]  ;;  %v1140_v25 = vor.u32 %v1190_v20, %v1137_v22  ;;  %v1185_v26 = vld [vmem:[#allocation6 + $0xa4] sm:$0xf]  ;;  %v1113_v27 = vld [vmem:[#allocation6 + $0xb0] sm:$0xf0] }
  0x16   :  { %v1119_v28 = vld [vmem:[#allocation6 + $0xa8] sm:$0xf]  ;;  %449 = vmatpush.bf16.msra.mxu0 %v1128_v16  ;;  %v1112_v29 = vor.u32 %v1187_v24, %v1111_v23  ;;  %v1188_v30 = vld [vmem:[#allocation6 + $0xb4] sm:$0xf0]  ;;  %v1186_v31 = vld [vmem:[#allocation6 + $0xac] sm:$0xf]  ;;  %v1116_v33 = vor.u32 %v1185_v26, %v1113_v27 }
  0x17   :  { %v1121_v32 = vld [vmem:[#allocation6 + $0xb8] sm:$0xf0]  ;;  %498 = vmatpush.bf16.msra.mxu1 %v1132_v17  ;;  %v1120_v34 = vor.u32 %v1188_v30, %v1119_v28  ;;  %v1095_v35 = vld [vmem:[#allocation6 + $0x80] sm:$0xf]  ;;  %v1183_v36 = vld [vmem:[#allocation6 + $0x8c] sm:$0xf0] }
  0x18   :  { %547 = vmatpush.bf16.msra.mxu2 %v1136_v21  ;;  %v1181_v37 = vld [vmem:[#allocation6 + $0x84] sm:$0xf]  ;;  %596 = vmatpush.bf16.msra.mxu3 %v1140_v25  ;;  %v1124_v38 = vor.u32 %v1186_v31, %v1121_v32  ;;  %v1097_v39 = vld [vmem:[#allocation6 + $0x90] sm:$0xf0]  ;;  %v1103_v40 = vld [vmem:[#allocation6 + $0x88] sm:$0xf]  ;;  %v1096_v44 = vor.u32 %v1183_v36, %v1095_v35 }
  0x19   :  { %v1184_v41 = vld [vmem:[#allocation6 + $0x94] sm:$0xf0]  ;;  %v1182_v42 = vld [vmem:[#allocation6 + $0x8c] sm:$0xf]  ;;  %v1105_v43 = vld [vmem:[#allocation6 + $0x98] sm:$0xf0]  ;;  %v1100_v45 = vor.u32 %v1181_v37, %v1097_v39 }
  0x1a   :  { %450 = vmatpush.bf16.msra.mxu0 %v1112_v29  ;;  %v1104_v46 = vor.u32 %v1184_v41, %v1103_v40  ;;  %v1079_v47 = vld [vmem:[#allocation6 + $0x60] sm:$0xf]  ;;  %v1179_v48 = vld [vmem:[#allocation6 + $0x6c] sm:$0xf0]  ;;  %v1177_v49 = vld [vmem:[#allocation6 + $0x64] sm:$0xf]  ;;  %v1108_v50 = vor.u32 %v1182_v42, %v1105_v43 }
  0x1b   :  { %499 = vmatpush.bf16.msra.mxu1 %v1116_v33  ;;  %v1081_v51 = vld [vmem:[#allocation6 + $0x70] sm:$0xf0]  ;;  %v1087_v52 = vld [vmem:[#allocation6 + $0x68] sm:$0xf]  ;;  %v1180_v53 = vld [vmem:[#allocation6 + $0x74] sm:$0xf0]  ;;  %v1080_v56 = vor.u32 %v1179_v48, %v1079_v47 }
  0x1c   :  { %548 = vmatpush.bf16.msra.mxu2 %v1120_v34  ;;  %597 = vmatpush.bf16.msra.mxu3 %v1124_v38  ;;  %v1178_v54 = vld [vmem:[#allocation6 + $0x6c] sm:$0xf]  ;;  %v1089_v55 = vld [vmem:[#allocation6 + $0x78] sm:$0xf0]  ;;  %v1084_v57 = vor.u32 %v1177_v49, %v1081_v51  ;;  %v1088_v58 = vor.u32 %v1180_v53, %v1087_v52  ;;  %v1063_v59 = vld [vmem:[#allocation6 + $0x40] sm:$0xf] }
  0x1d   :  { %v1175_v60 = vld [vmem:[#allocation6 + $0x4c] sm:$0xf0]  ;;  %v1173_v61 = vld [vmem:[#allocation6 + $0x44] sm:$0xf]  ;;  %v1092_v62 = vor.u32 %v1178_v54, %v1089_v55  ;;  %v1065_v63 = vld [vmem:[#allocation6 + $0x50] sm:$0xf0] }
  0x1e   :  { %451 = vmatpush.bf16.msra.mxu0 %v1096_v44  ;;  %v1071_v0 = vld [vmem:[#allocation6 + $0x48] sm:$0xf]  ;;  %v1176_v1 = vld [vmem:[#allocation6 + $0x54] sm:$0xf0]  ;;  %v1174_v2 = vld [vmem:[#allocation6 + $0x4c] sm:$0xf]  ;;  %v1064_v4 = vor.u32 %v1175_v60, %v1063_v59  ;;  %v1068_v5 = vor.u32 %v1173_v61, %v1065_v63 }
  0x1f   :  { %500 = vmatpush.bf16.msra.mxu1 %v1100_v45  ;;  %v1073_v3 = vld [vmem:[#allocation6 + $0x58] sm:$0xf0]  ;;  %v1072_v6 = vor.u32 %v1176_v1, %v1071_v0  ;;  %v1047_v7 = vld [vmem:[#allocation6 + $0x20] sm:$0xf]  ;;  %v1171_v8 = vld [vmem:[#allocation6 + $0x2c] sm:$0xf0] }
  0x20   :  { %549 = vmatpush.bf16.msra.mxu2 %v1104_v46  ;;  %598 = vmatpush.bf16.msra.mxu3 %v1108_v50  ;;  %v1169_v9 = vld [vmem:[#allocation6 + $0x24] sm:$0xf]  ;;  %v1076_v10 = vor.u32 %v1174_v2, %v1073_v3  ;;  %v1049_v11 = vld [vmem:[#allocation6 + $0x30] sm:$0xf0]  ;;  %v1055_v12 = vld [vmem:[#allocation6 + $0x28] sm:$0xf]  ;;  %v1048_v16 = vor.u32 %v1171_v8, %v1047_v7 }
  0x21   :  { %v1172_v13 = vld [vmem:[#allocation6 + $0x34] sm:$0xf0]  ;;  %v1170_v14 = vld [vmem:[#allocation6 + $0x2c] sm:$0xf]  ;;  %v1057_v15 = vld [vmem:[#allocation6 + $0x38] sm:$0xf0]  ;;  %v1052_v17 = vor.u32 %v1169_v9, %v1049_v11 }
  0x22   :  { %452 = vmatpush.bf16.msra.mxu0 %v1080_v56  ;;  %v1056_v18 = vor.u32 %v1172_v13, %v1055_v12  ;;  %v1031_v19 = vld [vmem:[#allocation6] sm:$0xf]  ;;  %v1167_v20 = vld [vmem:[#allocation6 + $0xc] sm:$0xf0]  ;;  %v1165_v21 = vld [vmem:[#allocation6 + $0x4] sm:$0xf]  ;;  %v1060_v22 = vor.u32 %v1170_v14, %v1057_v15 }
  0x23   :  { %501 = vmatpush.bf16.msra.mxu1 %v1084_v57  ;;  %v1033_v23 = vld [vmem:[#allocation6 + $0x10] sm:$0xf0]  ;;  %v1039_v24 = vld [vmem:[#allocation6 + $0x8] sm:$0xf]  ;;  %v1168_v25 = vld [vmem:[#allocation6 + $0x14] sm:$0xf0]  ;;  %v1032_v28 = vor.u32 %v1167_v20, %v1031_v19 }
  0x24   :  { %550 = vmatpush.bf16.msra.mxu2 %v1088_v58  ;;  %599 = vmatpush.bf16.msra.mxu3 %v1092_v62  ;;  %v1166_v26 = vld [vmem:[#allocation6 + $0xc] sm:$0xf]  ;;  %v1041_v27 = vld [vmem:[#allocation6 + $0x18] sm:$0xf0]  ;;  %v1036_v29 = vor.u32 %v1165_v21, %v1033_v23  ;;  %v1040_v30 = vor.u32 %v1168_v25, %v1039_v24  ;;  %v1157_v32 = vld [vmem:[#allocation3] sm:$0xff]  ;;  %s1316_s0 = smov [#allocation9]  }
  0x25   :  { %v1044_v31 = vor.u32 %v1166_v26, %v1041_v27  ;;  %v1158_v33 = vld [vmem:[#allocation3 + $0x8] sm:$0xff]  ;;  %v1159_v34 = vld [vmem:[#allocation3 + $0x10] sm:$0xff]  ;;  %v1160_v35 = vld [vmem:[#allocation3 + $0x18] sm:$0xff]  ;;  %s981_s2 = sshll.u32 %s1316_s0, 4  ;;  %s983_s5 = sshll.u32 %s1426_s3, 4  ;;  %s982_s2 = int_to_ptr.vmem [resolvable:$true] %s981_s2  ;;  %s984_s5 = int_to_ptr.hbm [resolvable:$true] %s983_s5 }
  0x26   :  { %453 = vmatpush.bf16.msra.mxu0 %v1064_v4  ;;  %v1161_v36 = vld [vmem:[#allocation3 + $0x20] sm:$0xff]  ;;  %v1162_v37 = vld [vmem:[#allocation3 + $0x28] sm:$0xff]  ;;  %v1163_v38 = vld [vmem:[#allocation3 + $0x30] sm:$0xff]  ;;  %s1317_s6 = smov 512   ;;  %s1318_s7 = smov 32  }
  0x27   :  { %502 = vmatpush.bf16.msra.mxu1 %v1068_v5  ;;  %v1164_v39 = vld [vmem:[#allocation3 + $0x38] sm:$0xff]  ;;  %v839_v40 = vld [vmem:[#allocation8] sm:$0xf] }
  0x28   :  { %551 = vmatpush.bf16.msra.mxu2 %v1072_v6  ;;  %600 = vmatpush.bf16.msra.mxu3 %v1076_v10  ;;  %v1348_v41 = vperm.slane %v839_v40, 0  ;;  %v1350_v42 = vperm.slane %v839_v40, 1  ;;  %v1354_v47 = vperm.slane %v839_v40, 2  ;;  %v1356_v48 = vperm.slane %v839_v40, 3 }
  0x2a   :  { %454 = vmatpush.bf16.msra.mxu0 %v1048_v16 }
  0x2b   :  { %503 = vmatpush.bf16.msra.mxu1 %v1052_v17 }
  0x2c   :  { %552 = vmatpush.bf16.msra.mxu2 %v1056_v18  ;;  %601 = vmatpush.bf16.msra.mxu3 %v1060_v22 }
  0x2e   :  { %455 = vmatpush.bf16.msra.mxu0 %v1032_v28 }
  0x2f   :  { %504 = vmatpush.bf16.msra.mxu1 %v1036_v29 }
  0x30   :  { %553 = vmatpush.bf16.msra.mxu2 %v1040_v30  ;;  %602 = vmatpush.bf16.msra.mxu3 %v1044_v31 }
  0x31   :  { %456 = vmatmul.bf16.vlgmr.msra.gmra.mxu0 %v1157_v32 }
  0x32   :  { %505 = vmatmul.bf16.vlgmr.msra.gmra.mxu1 %v1157_v32 }
  0x33   :  { %554 = vmatmul.bf16.vlgmr.msra.gmra.mxu2 %v1157_v32  ;;  %603 = vmatmul.bf16.vlgmr.msra.gmra.mxu3 %v1157_v32 }
  0x41   :  { %461 = vmatmul.bf16.gmra.mxu0 %v1158_v33 }
  0x42   :  { %510 = vmatmul.bf16.gmra.mxu1 %v1158_v33 }
  0x43   :  { %559 = vmatmul.bf16.gmra.mxu2 %v1158_v33  ;;  %608 = vmatmul.bf16.gmra.mxu3 %v1158_v33 }
  0x51   :  { %466 = vmatmul.bf16.gmra.mxu0 %v1159_v34 }
  0x52   :  { %515 = vmatmul.bf16.gmra.mxu1 %v1159_v34 }
  0x53   :  { %564 = vmatmul.bf16.gmra.mxu2 %v1159_v34  ;;  %613 = vmatmul.bf16.gmra.mxu3 %v1159_v34 }
  0x61   :  { %471 = vmatmul.bf16.gmra.mxu0 %v1160_v35 }
  0x62   :  { %520 = vmatmul.bf16.gmra.mxu1 %v1160_v35 }
  0x63   :  { %569 = vmatmul.bf16.gmra.mxu2 %v1160_v35  ;;  %618 = vmatmul.bf16.gmra.mxu3 %v1160_v35 }
  0x71   :  { %476 = vmatmul.bf16.gmra.mxu0 %v1161_v36 }
  0x72   :  { %525 = vmatmul.bf16.gmra.mxu1 %v1161_v36 }
  0x73   :  { %574 = vmatmul.bf16.gmra.mxu2 %v1161_v36  ;;  %623 = vmatmul.bf16.gmra.mxu3 %v1161_v36 }
  0x81   :  { %481 = vmatmul.bf16.gmra.mxu0 %v1162_v37 }
  0x82   :  { %530 = vmatmul.bf16.gmra.mxu1 %v1162_v37 }
  0x83   :  { %579 = vmatmul.bf16.gmra.mxu2 %v1162_v37  ;;  %628 = vmatmul.bf16.gmra.mxu3 %v1162_v37 }
  0x91   :  { %486 = vmatmul.bf16.gmra.mxu0 %v1163_v38 }
  0x92   :  { %535 = vmatmul.bf16.gmra.mxu1 %v1163_v38 }
  0x93   :  { %584 = vmatmul.bf16.gmra.mxu2 %v1163_v38  ;;  %633 = vmatmul.bf16.gmra.mxu3 %v1163_v38 }
  0xa1   :  { %491 = vmatmul.bf16.gmra.mxu0 %v1164_v39 }
  0xa2   :  { %540 = vmatmul.bf16.gmra.mxu1 %v1164_v39 }
  0xa3   :  { %589 = vmatmul.bf16.gmra.mxu2 %v1164_v39  ;;  %638 = vmatmul.bf16.gmra.mxu3 %v1164_v39 }
  0xae   :  { %v457_v43 = vpop.f32.mrf.mxu0 }
  0xaf   :  { %v849_v44 = vadd.f32 %v1348_v41, %v457_v43  ;;  %v506_v45 = vpop.f32.mrf.mxu1 }
  0xb0   :  { %v850_v46 = vadd.f32 %v1350_v42, %v506_v45 }
  0xb1   :  { %913 = vst [vmem:[#allocation9] sm:$0xff] %v849_v44 }
  0xb2   :  { %914 = vst [vmem:[#allocation9 + $0x8] sm:$0xff] %v850_v46 }
  0xb6   :  { %v555_v49 = vpop.f32.mrf.mxu2  ;;  %v604_v51 = vpop.f32.mrf.mxu3 }
  0xb7   :  { %v851_v50 = vadd.f32 %v1354_v47, %v555_v49  ;;  %v459_v52 = vpop.f32.mrf.mxu0  ;;  %v852_v53 = vadd.f32 %v1356_v48, %v604_v51  ;;  %v508_v55 = vpop.f32.mrf.mxu1 }
  0xb8   :  { %v853_v54 = vadd.f32 %v1348_v41, %v459_v52  ;;  %v854_v56 = vadd.f32 %v1350_v42, %v508_v55 }
  0xb9   :  { %915 = vst [vmem:[#allocation9 + $0x10] sm:$0xff] %v851_v50 }
  0xba   :  { %916 = vst [vmem:[#allocation9 + $0x18] sm:$0xff] %v852_v53 }
  0xbb   :  { %917 = vst [vmem:[#allocation9 + $0x20] sm:$0xff] %v853_v54 }
  0xbc   :  { %918 = vst [vmem:[#allocation9 + $0x28] sm:$0xff] %v854_v56 }
  0xbe   :  { %v557_v57 = vpop.f32.mrf.mxu2  ;;  %v606_v59 = vpop.f32.mrf.mxu3 }
  0xbf   :  { %v855_v58 = vadd.f32 %v1354_v47, %v557_v57  ;;  %v462_v60 = vpop.f32.mrf.mxu0  ;;  %v856_v61 = vadd.f32 %v1356_v48, %v606_v59  ;;  %v511_v63 = vpop.f32.mrf.mxu1 }
  0xc0   :  { %v857_v62 = vadd.f32 %v1348_v41, %v462_v60  ;;  %v858_v0 = vadd.f32 %v1350_v42, %v511_v63 }
  0xc1   :  { %919 = vst [vmem:[#allocation9 + $0x30] sm:$0xff] %v855_v58 }
  0xc2   :  { %920 = vst [vmem:[#allocation9 + $0x38] sm:$0xff] %v856_v61 }
  0xc3   :  { %921 = vst [vmem:[#allocation9 + $0x40] sm:$0xff] %v857_v62 }
  0xc4   :  { %922 = vst [vmem:[#allocation9 + $0x48] sm:$0xff] %v858_v0 }
  0xc6   :  { %v560_v1 = vpop.f32.mrf.mxu2  ;;  %v609_v3 = vpop.f32.mrf.mxu3 }
  0xc7   :  { %v859_v2 = vadd.f32 %v1354_v47, %v560_v1  ;;  %v464_v4 = vpop.f32.mrf.mxu0  ;;  %v860_v5 = vadd.f32 %v1356_v48, %v609_v3  ;;  %v513_v7 = vpop.f32.mrf.mxu1 }
  0xc8   :  { %v861_v6 = vadd.f32 %v1348_v41, %v464_v4  ;;  %v862_v8 = vadd.f32 %v1350_v42, %v513_v7 }
  0xc9   :  { %923 = vst [vmem:[#allocation9 + $0x50] sm:$0xff] %v859_v2 }
  0xca   :  { %924 = vst [vmem:[#allocation9 + $0x58] sm:$0xff] %v860_v5 }
  0xcb   :  { %925 = vst [vmem:[#allocation9 + $0x60] sm:$0xff] %v861_v6 }
  0xcc   :  { %926 = vst [vmem:[#allocation9 + $0x68] sm:$0xff] %v862_v8 }
  0xce   :  { %v562_v9 = vpop.f32.mrf.mxu2  ;;  %v611_v11 = vpop.f32.mrf.mxu3 }
  0xcf   :  { %v863_v10 = vadd.f32 %v1354_v47, %v562_v9  ;;  %v467_v12 = vpop.f32.mrf.mxu0  ;;  %v864_v13 = vadd.f32 %v1356_v48, %v611_v11  ;;  %v516_v15 = vpop.f32.mrf.mxu1 }
  0xd0   :  { %v865_v14 = vadd.f32 %v1348_v41, %v467_v12  ;;  %v866_v16 = vadd.f32 %v1350_v42, %v516_v15 }
  0xd1   :  { %927 = vst [vmem:[#allocation9 + $0x70] sm:$0xff] %v863_v10 }
  0xd2   :  { %928 = vst [vmem:[#allocation9 + $0x78] sm:$0xff] %v864_v13 }
  0xd3   :  { %929 = vst [vmem:[#allocation9 + $0x80] sm:$0xff] %v865_v14 }
  0xd4   :  { %930 = vst [vmem:[#allocation9 + $0x88] sm:$0xff] %v866_v16 }
  0xd6   :  { %v565_v17 = vpop.f32.mrf.mxu2  ;;  %v614_v19 = vpop.f32.mrf.mxu3 }
  0xd7   :  { %v867_v18 = vadd.f32 %v1354_v47, %v565_v17  ;;  %v469_v20 = vpop.f32.mrf.mxu0  ;;  %v868_v21 = vadd.f32 %v1356_v48, %v614_v19  ;;  %v518_v23 = vpop.f32.mrf.mxu1 }
  0xd8   :  { %v869_v22 = vadd.f32 %v1348_v41, %v469_v20  ;;  %v870_v24 = vadd.f32 %v1350_v42, %v518_v23 }
  0xd9   :  { %931 = vst [vmem:[#allocation9 + $0x90] sm:$0xff] %v867_v18 }
  0xda   :  { %932 = vst [vmem:[#allocation9 + $0x98] sm:$0xff] %v868_v21 }
  0xdb   :  { %933 = vst [vmem:[#allocation9 + $0xa0] sm:$0xff] %v869_v22 }
  0xdc   :  { %934 = vst [vmem:[#allocation9 + $0xa8] sm:$0xff] %v870_v24 }
  0xde   :  { %v567_v25 = vpop.f32.mrf.mxu2  ;;  %v616_v27 = vpop.f32.mrf.mxu3 }
  0xdf   :  { %v871_v26 = vadd.f32 %v1354_v47, %v567_v25  ;;  %v472_v28 = vpop.f32.mrf.mxu0  ;;  %v872_v29 = vadd.f32 %v1356_v48, %v616_v27  ;;  %v521_v31 = vpop.f32.mrf.mxu1 }
  0xe0   :  { %v873_v30 = vadd.f32 %v1348_v41, %v472_v28  ;;  %v874_v32 = vadd.f32 %v1350_v42, %v521_v31 }
  0xe1   :  { %935 = vst [vmem:[#allocation9 + $0xb0] sm:$0xff] %v871_v26 }
  0xe2   :  { %936 = vst [vmem:[#allocation9 + $0xb8] sm:$0xff] %v872_v29 }
  0xe3   :  { %937 = vst [vmem:[#allocation9 + $0xc0] sm:$0xff] %v873_v30 }
  0xe4   :  { %938 = vst [vmem:[#allocation9 + $0xc8] sm:$0xff] %v874_v32 }
  0xe6   :  { %v570_v33 = vpop.f32.mrf.mxu2  ;;  %v619_v35 = vpop.f32.mrf.mxu3 }
  0xe7   :  { %v875_v34 = vadd.f32 %v1354_v47, %v570_v33  ;;  %v474_v36 = vpop.f32.mrf.mxu0  ;;  %v876_v37 = vadd.f32 %v1356_v48, %v619_v35  ;;  %v523_v39 = vpop.f32.mrf.mxu1 }
  0xe8   :  { %v877_v38 = vadd.f32 %v1348_v41, %v474_v36  ;;  %v878_v40 = vadd.f32 %v1350_v42, %v523_v39 }
  0xe9   :  { %939 = vst [vmem:[#allocation9 + $0xd0] sm:$0xff] %v875_v34 }
  0xea   :  { %940 = vst [vmem:[#allocation9 + $0xd8] sm:$0xff] %v876_v37 }
  0xeb   :  { %941 = vst [vmem:[#allocation9 + $0xe0] sm:$0xff] %v877_v38 }
  0xec   :  { %942 = vst [vmem:[#allocation9 + $0xe8] sm:$0xff] %v878_v40 }
  0xee   :  { %v572_v43 = vpop.f32.mrf.mxu2  ;;  %v621_v45 = vpop.f32.mrf.mxu3 }
  0xef   :  { %v879_v44 = vadd.f32 %v1354_v47, %v572_v43  ;;  %v477_v46 = vpop.f32.mrf.mxu0  ;;  %v880_v49 = vadd.f32 %v1356_v48, %v621_v45  ;;  %v526_v51 = vpop.f32.mrf.mxu1 }
  0xf0   :  { %v881_v50 = vadd.f32 %v1348_v41, %v477_v46  ;;  %v882_v52 = vadd.f32 %v1350_v42, %v526_v51 }
  0xf1   :  { %943 = vst [vmem:[#allocation9 + $0xf0] sm:$0xff] %v879_v44 }
  0xf2   :  { %944 = vst [vmem:[#allocation9 + $0xf8] sm:$0xff] %v880_v49 }
  0xf3   :  { %945 = vst [vmem:[#allocation9 + $0x100] sm:$0xff] %v881_v50 }
  0xf4   :  { %946 = vst [vmem:[#allocation9 + $0x108] sm:$0xff] %v882_v52 }
  0xf6   :  { %v575_v53 = vpop.f32.mrf.mxu2  ;;  %v624_v55 = vpop.f32.mrf.mxu3 }
  0xf7   :  { %v883_v54 = vadd.f32 %v1354_v47, %v575_v53  ;;  %v479_v56 = vpop.f32.mrf.mxu0  ;;  %v884_v57 = vadd.f32 %v1356_v48, %v624_v55  ;;  %v528_v59 = vpop.f32.mrf.mxu1 }
  0xf8   :  { %v885_v58 = vadd.f32 %v1348_v41, %v479_v56  ;;  %v886_v60 = vadd.f32 %v1350_v42, %v528_v59 }
  0xf9   :  { %947 = vst [vmem:[#allocation9 + $0x110] sm:$0xff] %v883_v54 }
  0xfa   :  { %948 = vst [vmem:[#allocation9 + $0x118] sm:$0xff] %v884_v57 }
  0xfb   :  { %949 = vst [vmem:[#allocation9 + $0x120] sm:$0xff] %v885_v58 }
  0xfc   :  { %950 = vst [vmem:[#allocation9 + $0x128] sm:$0xff] %v886_v60 }
  0xfe   :  { %v577_v61 = vpop.f32.mrf.mxu2  ;;  %v626_v63 = vpop.f32.mrf.mxu3 }
  0xff   :  { %v887_v62 = vadd.f32 %v1354_v47, %v577_v61  ;;  %v482_v0 = vpop.f32.mrf.mxu0  ;;  %v888_v1 = vadd.f32 %v1356_v48, %v626_v63  ;;  %v531_v3 = vpop.f32.mrf.mxu1 }
 0x100   :  { %v889_v2 = vadd.f32 %v1348_v41, %v482_v0  ;;  %v890_v4 = vadd.f32 %v1350_v42, %v531_v3 }
 0x101   :  { %951 = vst [vmem:[#allocation9 + $0x130] sm:$0xff] %v887_v62 }
 0x102   :  { %952 = vst [vmem:[#allocation9 + $0x138] sm:$0xff] %v888_v1 }
 0x103   :  { %953 = vst [vmem:[#allocation9 + $0x140] sm:$0xff] %v889_v2 }
 0x104   :  { %954 = vst [vmem:[#allocation9 + $0x148] sm:$0xff] %v890_v4 }
 0x106   :  { %v580_v5 = vpop.f32.mrf.mxu2  ;;  %v629_v7 = vpop.f32.mrf.mxu3 }
 0x107   :  { %v891_v6 = vadd.f32 %v1354_v47, %v580_v5  ;;  %v484_v8 = vpop.f32.mrf.mxu0  ;;  %v892_v9 = vadd.f32 %v1356_v48, %v629_v7  ;;  %v533_v11 = vpop.f32.mrf.mxu1 }
 0x108   :  { %v893_v10 = vadd.f32 %v1348_v41, %v484_v8  ;;  %v894_v12 = vadd.f32 %v1350_v42, %v533_v11 }
 0x109   :  { %955 = vst [vmem:[#allocation9 + $0x150] sm:$0xff] %v891_v6 }
 0x10a   :  { %956 = vst [vmem:[#allocation9 + $0x158] sm:$0xff] %v892_v9 }
 0x10b   :  { %957 = vst [vmem:[#allocation9 + $0x160] sm:$0xff] %v893_v10 }
 0x10c   :  { %958 = vst [vmem:[#allocation9 + $0x168] sm:$0xff] %v894_v12 }
 0x10e   :  { %v582_v13 = vpop.f32.mrf.mxu2  ;;  %v631_v15 = vpop.f32.mrf.mxu3 }
 0x10f   :  { %v895_v14 = vadd.f32 %v1354_v47, %v582_v13  ;;  %v487_v16 = vpop.f32.mrf.mxu0  ;;  %v896_v17 = vadd.f32 %v1356_v48, %v631_v15  ;;  %v536_v19 = vpop.f32.mrf.mxu1 }
 0x110   :  { %v897_v18 = vadd.f32 %v1348_v41, %v487_v16  ;;  %v898_v20 = vadd.f32 %v1350_v42, %v536_v19 }
 0x111   :  { %959 = vst [vmem:[#allocation9 + $0x170] sm:$0xff] %v895_v14 }
 0x112   :  { %960 = vst [vmem:[#allocation9 + $0x178] sm:$0xff] %v896_v17 }
 0x113   :  { %961 = vst [vmem:[#allocation9 + $0x180] sm:$0xff] %v897_v18 }
 0x114   :  { %962 = vst [vmem:[#allocation9 + $0x188] sm:$0xff] %v898_v20 }
 0x116   :  { %v585_v21 = vpop.f32.mrf.mxu2  ;;  %v634_v23 = vpop.f32.mrf.mxu3 }
 0x117   :  { %v899_v22 = vadd.f32 %v1354_v47, %v585_v21  ;;  %v489_v24 = vpop.f32.mrf.mxu0  ;;  %v900_v25 = vadd.f32 %v1356_v48, %v634_v23  ;;  %v538_v27 = vpop.f32.mrf.mxu1 }
 0x118   :  { %v901_v26 = vadd.f32 %v1348_v41, %v489_v24  ;;  %v902_v28 = vadd.f32 %v1350_v42, %v538_v27 }
 0x119   :  { %963 = vst [vmem:[#allocation9 + $0x190] sm:$0xff] %v899_v22 }
 0x11a   :  { %964 = vst [vmem:[#allocation9 + $0x198] sm:$0xff] %v900_v25 }
 0x11b   :  { %965 = vst [vmem:[#allocation9 + $0x1a0] sm:$0xff] %v901_v26 }
 0x11c   :  { %966 = vst [vmem:[#allocation9 + $0x1a8] sm:$0xff] %v902_v28 }
 0x11e   :  { %v587_v29 = vpop.f32.mrf.mxu2  ;;  %v636_v31 = vpop.f32.mrf.mxu3 }
 0x11f   :  { %v903_v30 = vadd.f32 %v1354_v47, %v587_v29  ;;  %v492_v32 = vpop.f32.mrf.mxu0  ;;  %v904_v33 = vadd.f32 %v1356_v48, %v636_v31  ;;  %v541_v35 = vpop.f32.mrf.mxu1 }
 0x120   :  { %v905_v34 = vadd.f32 %v1348_v41, %v492_v32  ;;  %v906_v36 = vadd.f32 %v1350_v42, %v541_v35 }
 0x121   :  { %967 = vst [vmem:[#allocation9 + $0x1b0] sm:$0xff] %v903_v30 }
 0x122   :  { %968 = vst [vmem:[#allocation9 + $0x1b8] sm:$0xff] %v904_v33 }
 0x123   :  { %969 = vst [vmem:[#allocation9 + $0x1c0] sm:$0xff] %v905_v34 }
 0x124   :  { %970 = vst [vmem:[#allocation9 + $0x1c8] sm:$0xff] %v906_v36 }
 0x126   :  { %v590_v37 = vpop.f32.mrf.mxu2  ;;  %v639_v39 = vpop.f32.mrf.mxu3 }
 0x127   :  { %v907_v38 = vadd.f32 %v1354_v47, %v590_v37  ;;  %v494_v40 = vpop.f32.mrf.mxu0  ;;  %v908_v43 = vadd.f32 %v1356_v48, %v639_v39  ;;  %v543_v45 = vpop.f32.mrf.mxu1 }
 0x128   :  { %v909_v44 = vadd.f32 %v1348_v41, %v494_v40  ;;  %v910_v46 = vadd.f32 %v1350_v42, %v543_v45 }
 0x129   :  { %971 = vst [vmem:[#allocation9 + $0x1d0] sm:$0xff] %v907_v38 }
 0x12a   :  { %972 = vst [vmem:[#allocation9 + $0x1d8] sm:$0xff] %v908_v43 }
 0x12b   :  { %973 = vst [vmem:[#allocation9 + $0x1e0] sm:$0xff] %v909_v44 }
 0x12c   :  { %974 = vst [vmem:[#allocation9 + $0x1e8] sm:$0xff] %v910_v46 }
 0x12e   :  { %v592_v49 = vpop.f32.mrf.mxu2  ;;  %v641_v51 = vpop.f32.mrf.mxu3 }
 0x12f   :  { %v911_v50 = vadd.f32 %v1354_v47, %v592_v49  ;;  %v912_v41 = vadd.f32 %v1356_v48, %v641_v51 }
 0x131   :  { %975 = vst [vmem:[#allocation9 + $0x1f0] sm:$0xff] %v911_v50 }
 0x132   :  { %976 = vst [vmem:[#allocation9 + $0x1f8] sm:$0xff] %v912_v41 }
 0x133   :  { %989 = dma.vmem_to_hbm [thread:$0]  %s982_s2, 8192, %s984_s5, [#allocation5], %s1317_s6, %s1317_s6, %s1318_s7  }
 0x134   :  { %1307 = dma.done.wait [#allocation5], 8192  }
 0x135   :  { %1308 = vsyncadd [#allocation5], 4294959104 }
 0x136   :  { %994 = vsyncpa [#allocation4], 1 }
 0x137   :  { %995 = vsyncpa [#allocation7], 1 }
 0x138   :  { %996 = vsyncpa [#allocation5], 1 }

</bundles_post_ra>
